<compile_context>
chip_gen: v7x
topology: tpu7x:2x2x1
jax: 0.10.0
libtpu: 0.0.40
codegen_flags: <defaults>
</compile_context>

<pallas_src>
import functools
import math

import jax
import jax.numpy as jnp
from jax.experimental import pallas as pl
from jax.experimental.pallas import tpu as pltpu

_VMEM_LIMIT = 32 * 1024 * 1024          # worst-case working set is ~10 MiB/step
_INV_SQRT2 = 1.0 / math.sqrt(2.0)


# ----------------------------- elementwise helpers -----------------------------
def _erf(x):
    # Abramowitz & Stegun 7.1.26 rational approximation (|err| < 1.5e-7).
    a1, a2, a3, a4, a5 = (0.254829592, -0.284496736, 1.421413741,
                          -1.453152027, 1.061405429)
    p = 0.3275911
    sgn = jnp.where(x >= 0.0, 1.0, -1.0)
    ax = jnp.abs(x)
    t = 1.0 / (1.0 + p * ax)
    poly = ((((a5 * t + a4) * t + a3) * t + a2) * t + a1) * t
    return sgn * (1.0 - poly * jnp.exp(-ax * ax))


def _gelu(x):
    # exact (erf-based) GELU, matching torch.nn.GELU() default
    return 0.5 * x * (1.0 + _erf(x * _INV_SQRT2))


def _sigmoid(x):
    return 1.0 / (1.0 + jnp.exp(-x))


# --------------------------------- ResBlock ------------------------------------
# TODO(synk): ResBlock is not defined in the reference snippet; implemented as
# y = GELU(x @ W + b) + (x @ Ws + bs) (linear block + linear residual projection)
# which matches the (in_dim -> out_dim) shape contract used by NeRV_Net_800.
def _resblock_kernel(x_ref, w_ref, b_ref, ws_ref, bs_ref, o_ref):
    x = x_ref[...]
    h = jnp.dot(x, w_ref[...], preferred_element_type=jnp.float32) + b_ref[...]
    s = jnp.dot(x, ws_ref[...], preferred_element_type=jnp.float32) + bs_ref[...]
    o_ref[...] = _gelu(h) + s


def resblock(x, w, b, ws, bs):
    batch = x.shape[0]
    dout = w.shape[1]
    return pl.pallas_call(
        _resblock_kernel,
        out_shape=jax.ShapeDtypeStruct((batch, dout), jnp.float32),
    )(x, w, b, ws, bs)


# ------------------------------ NeRVBlock kernels -------------------------------
def _conv_bias_stats_kernel(x_ref, w_ref, b_ref, y_ref, s1_ref, s2_ref, *, H, W, th):
    """3x3 conv (stride 1, pad 1) via 9 shifted matmuls, chunked over row groups.

    x_ref : (1, Cin, Fin)  zero-padded input flattened with row stride Wp=W+2,
                           Fin = (H+3)*Wp (1 top pad row, 2 bottom pad rows).
    w_ref : (9, ct, Cin)   per-tap weights, tap index t = 3*dh + dw.
    b_ref : (ct, 1)        conv bias.
    y_ref : (1, ct, L)     conv output on the (H, Wp) grid, L = H*Wp
                           (2 wrap-around garbage columns per row, stripped later).
    s1/s2 : (1, ct, 1)     per-(batch, channel) sum / sum-of-squares over valid
                           columns of this batch element.
    """
    Wp = W + 2
    ct = y_ref.shape[1]
    cin = x_ref.shape[1]

    bias = b_ref[...]                                       # (ct, 1)
    preload_w = ct * cin <= 4096
    w_taps = [w_ref[t] for t in range(9)] if preload_w else None

    # valid-column mask for a full row-chunk, hoisted out of the chunk loop
    lc_full = th * Wp
    col = jax.lax.broadcasted_iota(jnp.int32, (1, lc_full), 1) % Wp
    mask_full = (col < W).astype(jnp.float32)               # (1, th*Wp)

    ssum = jnp.zeros((ct, 1), jnp.float32)
    ssq = jnp.zeros((ct, 1), jnp.float32)

    n_full, rem = divmod(H, th)
    chunks = [(i * th, th) for i in range(n_full)]
    if rem:
        chunks.append((n_full * th, rem))

    for r0, rows in chunks:
        lc = rows * Wp
        c0 = r0 * Wp
        acc = None
        for t in range(9):
            dh, dw = divmod(t, 3)
            start = c0 + dh * Wp + dw                        # static offset
            xs = x_ref[0, :, start:start + lc]               # ref-level slice (Cin, lc)
            wt = w_taps[t] if preload_w else w_ref[t]
            part = jax.lax.dot_general(
                wt, xs,
                dimension_numbers=(((1,), (0,)), ((), ())),
                preferred_element_type=jnp.float32)
            acc = part if acc is None else acc + part
        acc = acc + bias
        y_ref[0, :, c0:c0 + lc] = acc                        # single store per chunk

        m = mask_full[:, :lc]
        am = acc * m
        ssum = ssum + jnp.sum(am, axis=1, keepdims=True)
        ssq = ssq + jnp.sum(am * acc, axis=1, keepdims=True)

    s1_ref[0] = ssum
    s2_ref[0] = ssq


def _bn_gelu_kernel(y_ref, a_ref, c_ref, o_ref, *, lane_chunk):
    # per-channel affine (folded BatchNorm) + exact GELU, chunked along lanes
    L = y_ref.shape[2]
    a = a_ref[...]
    c = c_ref[...]
    for c0 in range(0, L, lane_chunk):
        lc = min(lane_chunk, L - c0)
        o_ref[0, :, c0:c0 + lc] = _gelu(y_ref[0, :, c0:c0 + lc] * a + c)


def _pick_channel_tile(cpre, L):
    # Full channel range whenever the (cpre, L) f32 block is small (lane-dense
    # output, single grid step per batch, no repeated weight DMA); otherwise the
    # largest multiple-of-8 divisor keeping the block under ~4 MiB.
    if cpre * L * 4 <= 4 * 1024 * 1024:
        return cpre
    for cand in range(min(cpre, 256), 7, -8):
        if cpre % cand == 0 and cand * L * 4 <= 4 * 1024 * 1024:
            return cand
    return cpre


def _rows_per_chunk(ct, H, Wp):
    # Rows per in-kernel chunk: keep the (ct, rows*Wp) f32 accumulator within
    # ~24 vregs so the 9 tap accumulations stay in registers (no VMEM RMW),
    # while bounding the number of unrolled chunks.
    if H * Wp <= 1024:
        return H
    sublane_tiles = max(1, (ct + 7) // 8)
    lane_tiles = max(1, 24 // sublane_tiles)
    th = max(1, min(H, (lane_tiles * 128) // Wp))
    th = max(th, (H + 63) // 64)          # cap unrolled chunk count at ~64
    return th


def nerv_block(x, w9, bias, gamma, beta, r):
    """conv3x3(pad=1) -> PixelShuffle(r) -> BatchNorm2d(train stats) -> GELU."""
    B, Cin, H, W = x.shape
    cpre = w9.shape[1]
    cpost = cpre // (r * r)
    Wp = W + 2
    L = H * Wp
    Fin = (H + 3) * Wp

    # single pad: 1-pixel halo on all sides + one extra bottom row so the last
    # tap slice stays in bounds; reshape (merge of trailing dims) is free.
    xp = jnp.pad(x, ((0, 0), (0, 0), (1, 2), (1, 1)))
    xf = xp.reshape(B, Cin, Fin)

    ct = _pick_channel_tile(cpre, L)
    n_ct = cpre // ct
    th = _rows_per_chunk(ct, H, Wp)

    kern = functools.partial(_conv_bias_stats_kernel, H=H, W=W, th=th)
    y, s1, s2 = pl.pallas_call(
        kern,
        grid=(n_ct, B),
        in_specs=[
            pl.BlockSpec((1, Cin, Fin), lambda c, b: (b, 0, 0)),
            pl.BlockSpec((9, ct, Cin), lambda c, b: (0, c, 0)),
            pl.BlockSpec((ct, 1), lambda c, b: (c, 0)),
        ],
        out_specs=[
            pl.BlockSpec((1, ct, L), lambda c, b: (b, c, 0)),
            pl.BlockSpec((1, ct, 1), lambda c, b: (b, c, 0)),
            pl.BlockSpec((1, ct, 1), lambda c, b: (b, c, 0)),
        ],
        out_shape=[
            jax.ShapeDtypeStruct((B, cpre, L), jnp.float32),
            jax.ShapeDtypeStruct((B, cpre, 1), jnp.float32),
            jax.ShapeDtypeStruct((B, cpre, 1), jnp.float32),
        ],
        compiler_params=pltpu.CompilerParams(
            dimension_semantics=("parallel", "parallel"),
            vmem_limit_bytes=_VMEM_LIMIT),
    )(xf, w9, bias)

    # BatchNorm2d (train mode) statistics per post-shuffle channel == per group
    # of r*r consecutive pre-shuffle channels; biased variance, eps = 1e-5.
    cnt = float(B * r * r * H * W)
    sum_g = s1.sum(axis=0).reshape(cpost, r * r).sum(axis=1)
    sumsq_g = s2.sum(axis=0).reshape(cpost, r * r).sum(axis=1)
    mean_g = sum_g / cnt
    var_g = sumsq_g / cnt - mean_g * mean_g
    inv_g = jax.lax.rsqrt(var_g + 1e-5)
    a_g = gamma * inv_g
    c_g = beta - mean_g * a_g
    a_pre = jnp.repeat(a_g, r * r).reshape(cpre, 1)
    c_pre = jnp.repeat(c_g, r * r).reshape(cpre, 1)

    lane_chunk = 128 * max(1, 24 // max(1, (ct + 7) // 8))
    bn_kern = functools.partial(_bn_gelu_kernel, lane_chunk=lane_chunk)
    z = pl.pallas_call(
        bn_kern,
        grid=(n_ct, B),
        in_specs=[
            pl.BlockSpec((1, ct, L), lambda c, b: (b, c, 0)),
            pl.BlockSpec((ct, 1), lambda c, b: (c, 0)),
            pl.BlockSpec((ct, 1), lambda c, b: (c, 0)),
        ],
        out_specs=pl.BlockSpec((1, ct, L), lambda c, b: (b, c, 0)),
        out_shape=jax.ShapeDtypeStruct((B, cpre, L), jnp.float32),
        compiler_params=pltpu.CompilerParams(
            dimension_semantics=("parallel", "parallel"),
            vmem_limit_bytes=_VMEM_LIMIT),
    )(y, a_pre, c_pre)

    # strip wrap-around columns + PixelShuffle(r); XLA fuses this into one copy:
    # (B, cpost*r*r, H, W) -> (B, cpost, H*r, W*r)
    z = z.reshape(B, cpre, H, Wp)[:, :, :, :W]
    z = z.reshape(B, cpost, r, r, H, W).transpose(0, 1, 4, 2, 5, 3)
    return z.reshape(B, cpost, H * r, W * r)


# ------------------------------ final 1x1 conv ----------------------------------
def _final_conv_sigmoid_kernel(x_ref, w_ref, b_ref, o_ref):
    cout, cin = w_ref.shape
    for o in range(cout):
        z = jnp.zeros(o_ref.shape[2:], jnp.float32) + b_ref[o, 0]
        for i in range(cin):
            z = z + w_ref[o, i] * x_ref[0, i]
        o_ref[0, o] = _sigmoid(z)


def final_conv_sigmoid(x, w, b):
    B, Cin, H, W = x.shape
    Cout = w.shape[0]
    ht = H
    for cand in (80, 40, 16, 8):
        if H % cand == 0:
            ht = cand
            break
    return pl.pallas_call(
        _final_conv_sigmoid_kernel,
        grid=(B, H // ht),
        in_specs=[
            pl.BlockSpec((1, Cin, ht, W), lambda b, h: (b, 0, h, 0)),
            pl.BlockSpec(memory_space=pltpu.MemorySpace.SMEM),
            pl.BlockSpec(memory_space=pltpu.MemorySpace.SMEM),
        ],
        out_specs=pl.BlockSpec((1, Cout, ht, W), lambda b, h: (b, 0, h, 0)),
        out_shape=jax.ShapeDtypeStruct((B, Cout, H, W), jnp.float32),
        compiler_params=pltpu.CompilerParams(
            dimension_semantics=("parallel", "parallel"),
            vmem_limit_bytes=_VMEM_LIMIT),
    )(x, w, b)


# --------------------------- params / full forward ------------------------------
def init_params(key, init_dim, init_features, nerv_init, out_channels):
    keys = jax.random.split(key, 24)
    ki = iter(keys)

    def lin(din, dout):
        w = jax.random.normal(next(ki), (din, dout), jnp.float32) / math.sqrt(din)
        b = 0.01 * jax.random.normal(next(ki), (1, dout), jnp.float32)
        return w, b

    params = {}
    params["rb1_w"], params["rb1_b"] = lin(init_dim, init_features)
    params["rb1_ws"], params["rb1_bs"] = lin(init_dim, init_features)
    params["rb2_w"], params["rb2_b"] = lin(init_features, 4 * init_features)
    params["rb2_ws"], params["rb2_bs"] = lin(init_features, 4 * init_features)

    nb_specs = [
        (4 * init_features // 4, nerv_init, 5),
        (nerv_init, nerv_init // 2, 5),
        (nerv_init // 2, nerv_init // 4, 2),
        (nerv_init // 4, nerv_init // 8, 2),
        (nerv_init // 8, nerv_init // 16, 2),
        (nerv_init // 16, nerv_init // 32, 2),
    ]
    nb_params = []
    for cin, cpost, r in nb_specs:
        cpre = cpost * r * r
        w9 = jax.random.normal(next(ki), (9, cpre, cin), jnp.float32) / math.sqrt(9 * cin)
        bias = 0.01 * jax.random.normal(next(ki), (cpre, 1), jnp.float32)
        gamma = jnp.ones((cpost,), jnp.float32)    # BatchNorm2d default affine init
        beta = jnp.zeros((cpost,), jnp.float32)
        nb_params.append((w9, bias, gamma, beta))
    params["nb"] = nb_params
    params["nb_upscales"] = [r for _, _, r in nb_specs]   # static python ints

    cfin = nerv_init // 32
    params["final_w"] = jax.random.normal(next(ki), (out_channels, cfin),
                                          jnp.float32) / math.sqrt(cfin)
    params["final_b"] = 0.01 * jax.random.normal(next(ki), (out_channels, 1), jnp.float32)
    return params


def nerv_net_800_forward(coords, params):
    # opt.pos == 0 path: pe = coords
    pe = coords
    rb1 = resblock(pe, params["rb1_w"], params["rb1_b"],
                   params["rb1_ws"], params["rb1_bs"])
    rb2 = resblock(rb1, params["rb2_w"], params["rb2_b"],
                   params["rb2_ws"], params["rb2_bs"])
    B = rb2.shape[0]
    fc_dim = rb2.shape[1]
    x = rb2.reshape(B, fc_dim // 4, 2, 2)
    for (w9, bias, gamma, beta), r in zip(params["nb"], params["nb_upscales"]):
        x = nerv_block(x, w9, bias, gamma, beta, r)
    return final_conv_sigmoid(x, params["final_w"], params["final_b"])


if __name__ == "__main__":
    B = 2
    in_features = (1, 2)              # opt.pos == 0 -> init_dim = sum(in_features)
    init_dim = sum(in_features)       # 3
    init_features = 8
    nerv_init_features = 32
    out_channels = 3

    key = jax.random.PRNGKey(0)
    kp, kx = jax.random.split(key)
    params = init_params(kp, init_dim, init_features, nerv_init_features, out_channels)
    coords = jax.random.uniform(kx, (B, init_dim), dtype=jnp.float32)

    out = nerv_net_800_forward(coords, params)
    out = jax.block_until_ready(out)
    assert out.shape == (B, out_channels, 800, 800), out.shape
    assert bool(jnp.isfinite(out).all())
    print("KERNEL_OK")
</pallas_src>

<mosaic_0001>
module attributes {stable_mosaic.version = 11 : i64} {
  func.func @_resblock_kernel(%arg0: memref<2x3xf32, #tpu.memory_space<vmem>>, %arg1: memref<3x8xf32, #tpu.memory_space<vmem>>, %arg2: memref<1x8xf32, #tpu.memory_space<vmem>>, %arg3: memref<3x8xf32, #tpu.memory_space<vmem>>, %arg4: memref<1x8xf32, #tpu.memory_space<vmem>>, %arg5: memref<2x8xf32, #tpu.memory_space<vmem>>) attributes {dimension_semantics = [], scalar_prefetch = 0 : i64, scratch_operands = 0 : i64, tpu.core_type = #tpu.core_type<tc>} {
    %c0 = arith.constant 0 : index
    %c0_0 = arith.constant 0 : index
    %0 = vector.load %arg0[%c0, %c0_0] : memref<2x3xf32, #tpu.memory_space<vmem>>, vector<2x3xf32>
    %c0_1 = arith.constant 0 : index
    %c0_2 = arith.constant 0 : index
    %1 = vector.load %arg1[%c0_1, %c0_2] : memref<3x8xf32, #tpu.memory_space<vmem>>, vector<3x8xf32>
    %cst = arith.constant dense<0.000000e+00> : vector<2x8xf32>
    %2 = tpu.matmul %0, %1, %cst {dimension_numbers = #tpu.dot_dimension_numbers<[1], [0], [0], [1], [0, 0, 1, 1], [], []>} : vector<2x3xf32>, vector<3x8xf32>, vector<2x8xf32> -> vector<2x8xf32>
    %c0_3 = arith.constant 0 : index
    %c0_4 = arith.constant 0 : index
    %3 = vector.load %arg2[%c0_3, %c0_4] : memref<1x8xf32, #tpu.memory_space<vmem>>, vector<1x8xf32>
    %4 = vector.broadcast %3 : vector<1x8xf32> to vector<2x8xf32>
    %5 = arith.addf %2, %4 : vector<2x8xf32>
    %c0_5 = arith.constant 0 : index
    %c0_6 = arith.constant 0 : index
    %6 = vector.load %arg3[%c0_5, %c0_6] : memref<3x8xf32, #tpu.memory_space<vmem>>, vector<3x8xf32>
    %cst_7 = arith.constant dense<0.000000e+00> : vector<2x8xf32>
    %7 = tpu.matmul %0, %6, %cst_7 {dimension_numbers = #tpu.dot_dimension_numbers<[1], [0], [0], [1], [0, 0, 1, 1], [], []>} : vector<2x3xf32>, vector<3x8xf32>, vector<2x8xf32> -> vector<2x8xf32>
    %c0_8 = arith.constant 0 : index
    %c0_9 = arith.constant 0 : index
    %8 = vector.load %arg4[%c0_8, %c0_9] : memref<1x8xf32, #tpu.memory_space<vmem>>, vector<1x8xf32>
    %9 = vector.broadcast %8 : vector<1x8xf32> to vector<2x8xf32>
    %10 = arith.addf %7, %9 : vector<2x8xf32>
    %cst_10 = arith.constant 5.000000e-01 : f32
    %11 = vector.broadcast %cst_10 : f32 to vector<2x8xf32>
    %12 = arith.mulf %11, %5 : vector<2x8xf32>
    %cst_11 = arith.constant 0.707106769 : f32
    %13 = vector.broadcast %cst_11 : f32 to vector<2x8xf32>
    %14 = arith.mulf %5, %13 : vector<2x8xf32>
    %cst_12 = arith.constant 0.000000e+00 : f32
    %15 = vector.broadcast %cst_12 : f32 to vector<2x8xf32>
    %16 = arith.cmpf oge, %14, %15 : vector<2x8xf32>
    %cst_13 = arith.constant 1.000000e+00 : f32
    %cst_14 = arith.constant -1.000000e+00 : f32
    %17 = vector.broadcast %cst_13 : f32 to vector<2x8xf32>
    %18 = vector.broadcast %cst_14 : f32 to vector<2x8xf32>
    %19 = arith.select %16, %17, %18 : vector<2x8xi1>, vector<2x8xf32>
    %20 = math.absf %14 : vector<2x8xf32>
    %cst_15 = arith.constant 0.327591091 : f32
    %21 = vector.broadcast %cst_15 : f32 to vector<2x8xf32>
    %22 = arith.mulf %21, %20 : vector<2x8xf32>
    %cst_16 = arith.constant 1.000000e+00 : f32
    %23 = vector.broadcast %cst_16 : f32 to vector<2x8xf32>
    %24 = arith.addf %23, %22 : vector<2x8xf32>
    %cst_17 = arith.constant 1.000000e+00 : f32
    %25 = vector.broadcast %cst_17 : f32 to vector<2x8xf32>
    %26 = arith.divf %25, %24 : vector<2x8xf32>
    %cst_18 = arith.constant 1.06140542 : f32
    %27 = vector.broadcast %cst_18 : f32 to vector<2x8xf32>
    %28 = arith.mulf %27, %26 : vector<2x8xf32>
    %cst_19 = arith.constant -1.45315206 : f32
    %29 = vector.broadcast %cst_19 : f32 to vector<2x8xf32>
    %30 = arith.addf %28, %29 : vector<2x8xf32>
    %31 = arith.mulf %30, %26 : vector<2x8xf32>
    %cst_20 = arith.constant 1.42141378 : f32
    %32 = vector.broadcast %cst_20 : f32 to vector<2x8xf32>
    %33 = arith.addf %31, %32 : vector<2x8xf32>
    %34 = arith.mulf %33, %26 : vector<2x8xf32>
    %cst_21 = arith.constant -0.284496725 : f32
    %35 = vector.broadcast %cst_21 : f32 to vector<2x8xf32>
    %36 = arith.addf %34, %35 : vector<2x8xf32>
    %37 = arith.mulf %36, %26 : vector<2x8xf32>
    %cst_22 = arith.constant 0.254829586 : f32
    %38 = vector.broadcast %cst_22 : f32 to vector<2x8xf32>
    %39 = arith.addf %37, %38 : vector<2x8xf32>
    %40 = arith.mulf %39, %26 : vector<2x8xf32>
    %cst_23 = arith.constant 0.000000e+00 : f32
    %41 = vector.broadcast %cst_23 : f32 to vector<2x8xf32>
    %42 = arith.subf %41, %20 : vector<2x8xf32>
    %43 = arith.mulf %42, %20 : vector<2x8xf32>
    %44 = math.exp %43 : vector<2x8xf32>
    %45 = arith.mulf %40, %44 : vector<2x8xf32>
    %cst_24 = arith.constant 1.000000e+00 : f32
    %46 = vector.broadcast %cst_24 : f32 to vector<2x8xf32>
    %47 = arith.subf %46, %45 : vector<2x8xf32>
    %48 = arith.mulf %19, %47 : vector<2x8xf32>
    %cst_25 = arith.constant 1.000000e+00 : f32
    %49 = vector.broadcast %cst_25 : f32 to vector<2x8xf32>
    %50 = arith.addf %49, %48 : vector<2x8xf32>
    %51 = arith.mulf %12, %50 : vector<2x8xf32>
    %52 = arith.addf %51, %10 : vector<2x8xf32>
    %c0_26 = arith.constant 0 : index
    %c0_27 = arith.constant 0 : index
    %53 = vector.load %arg5[%c0_26, %c0_27] : memref<2x8xf32, #tpu.memory_space<vmem>>, vector<2x8xf32>
    tpu.vector_store %arg5[%c0_26, %c0_27], %52 {strides = array<i32>} : memref<2x8xf32, #tpu.memory_space<vmem>>, vector<2x8xf32>,
    return
  }
}

</mosaic_0001>

<bundles_post_ra>
// kernel: tpu_custom_call.1
= control target key start
LH: loop header
LB: loop body
LE: loop exit
PB: predicated region body
PF: predicated region fallthrough
CT: control target
= control target key end

     0   :  { %10 = vsyncpa [#allocation3], 0  ;;  %s442_s0 = inlined_call_operand.hbm [shape: f32[2,3], index: 0, kind: input, shape index: {}]   ;;  %s443_s1 = inlined_call_operand.hbm [shape: f32[3,8], index: 1, kind: input, shape index: {}]   ;;  %s444_s2 = inlined_call_operand.vmem [shape: f32[1,8], index: 2, kind: input, shape index: {}]   ;;  %s445_s3 = inlined_call_operand.vmem [shape: f32[3,8], index: 3, kind: input, shape index: {}]   ;;  %s446_s4 = inlined_call_operand.vmem [shape: f32[1,8], index: 4, kind: input, shape index: {}]   ;;  %s447_s5 = inlined_call_operand.hbm [shape: f32[2,8], index: 5, kind: output, shape index: {}]  }
   0x1   :  { %11 = vsyncpa [#allocation6], 0 }
   0x2   :  { %12 = vsyncpa [#allocation4], 0  ;;  %s361_s18 = smov [#allocation2]   ;;  %s362_s20 = smov [#allocation5]  }
   0x3   :  { %s19_s19 = sshll.u32 %s361_s18, 4  ;;  %s29_s21 = sshll.u32 %s362_s20, 4  ;;  %s20_s19 = int_to_ptr.vmem [resolvable:$true] %s19_s19  ;;  %s30_s21 = int_to_ptr.vmem [resolvable:$true] %s29_s21 }
   0x4   :  { %s289_s24 = scalar_lea.hbm %s442_s0, 32 }
   0x5   :  { %p290_p0 = scmp.ne.s32.totalorder %s442_s0, %s289_s24  ;;  %p293_p1 = scmp.lt.u32.totalorder %s289_s24, %s442_s0 }
   0x7   :  { %p295_p2 = pnand %p293_p1, %p290_p0 }
   0x9   :  { %298 = shalt.err (!%p295_p2)
}
   0xa   :  { %s299_s29 = scalar_lea.vmem %s20_s19, 32  ;;  %p304_p4 = scmp.lt.s32.totalorder %s20_s19, %s20_s19 }
   0xb   :  { %p300_p3 = scmp.ne.s32.totalorder %s20_s19, %s299_s29  ;;  %p305_p5 = scmp.lt.s32.totalorder %s299_s29, %s299_s29 }
   0xd   :  { %p306_p6 = por %p305_p5, %p304_p4 }
   0xf   :  { %p307_p7 = pnand %p306_p6, %p300_p3 }
  0x11   :  { %310 = shalt.err (!%p307_p7)
}
  0x12   :  { %22 = dma.hbm_to_vmem [thread:$0]  %s442_s0, 32, %s20_s19, [#allocation3]  }
  0x13   :  { %s311_s9 = scalar_lea.hbm %s443_s1, 64 }
  0x14   :  { %p312_p8 = scmp.ne.s32.totalorder %s443_s1, %s311_s9  ;;  %p315_p9 = scmp.lt.u32.totalorder %s311_s9, %s443_s1 }
  0x16   :  { %p317_p10 = pnand %p315_p9, %p312_p8 }
  0x18   :  { %320 = shalt.err (!%p317_p10)
}
  0x19   :  { %s321_s14 = scalar_lea.vmem %s30_s21, 64  ;;  %p326_p12 = scmp.lt.s32.totalorder %s30_s21, %s30_s21 }
  0x1a   :  { %p322_p11 = scmp.ne.s32.totalorder %s30_s21, %s321_s14  ;;  %p327_p13 = scmp.lt.s32.totalorder %s321_s14, %s321_s14 }
  0x1c   :  { %p328_p0 = por %p327_p13, %p326_p12 }
  0x1e   :  { %p329_p1 = pnand %p328_p0, %p322_p11 }
  0x20   :  { %332 = shalt.err (!%p329_p1)
}
  0x21   :  { %32 = dma.hbm_to_vmem [thread:$0]  %s443_s1, 64, %s30_s21, [#allocation6]  }
  0x22   :  { %355 = dma.done.wait [#allocation3], 32  }
  0x23   :  { %356 = vsyncadd [#allocation3], 4294967264 }
  0x24   :  { %357 = dma.done.wait [#allocation6], 64  }
  0x25   :  { %358 = vsyncadd [#allocation6], 4294967232  ;;  %v363_v0 = vmov 0.0   ;;  %vm364_vm0 = vmmov 0   ;;  %vm58_vm1 = vcmask 1042432   ;;  %vm54_vm2 = vcmask 23552  }
  0x26   :  { %269 = vmatprep.subr.mxu0 %v363_v0  ;;  %271 = vmatprep.mubr.msk.f32.mxu0 %vm364_vm0, %v363_v0  ;;  %v46_v1 = vld [vmem:[#allocation5] sm:$0x7]  ;;  %v45_v2 = vld [vmem:[#allocation2] sm:$0x3]  ;;  %v132_v3 = vld [vmem:[%s445_s3] sm:$0x7] }
  0x27   :  { %274 = vmatprep.subr.mxu1 %v363_v0  ;;  %276 = vmatprep.mubr.msk.f32.mxu1 %vm364_vm0, %v363_v0  ;;  %v259_v4 = vld [vmem:[%s444_s2] ss:$0 sm:$0xff]  ;;  %v365_v30 = vmov -1.0   ;;  %s366_s19 = smov [#allocation7]   ;;  %vm241_vm4 = vcmask 58368  }
  0x28   :  { %270 = vmatpush3.msk.msra.mxu0 %vm58_vm1, %v46_v1  ;;  %275 = vmatpush3.msk.msra.mxu1 %vm58_vm1, %v132_v3  ;;  %v262_v32 = vld [vmem:[%s446_s4] ss:$0 sm:$0xff]  ;;  %s249_s20 = sshll.u32 %s366_s19, 4  ;;  %s250_s20 = int_to_ptr.vmem [resolvable:$true] %s249_s20 }
  0x29   :  { %272 = vmatmul.mubr.msk.f32.vlgmr.msra.gmra.mrb[0].mxu0 %vm54_vm2, %v45_v2  ;;  %277 = vmatmul.mubr.msk.f32.vlgmr.msra.gmra.mrb[0].mxu1 %vm54_vm2, %v45_v2  ;;  %s333_s21 = scalar_lea.vmem %s250_s20, 32  ;;  %p338_p3 = scmp.lt.s32.totalorder %s250_s20, %s250_s20 }
  0x2a   :  { %p334_p2 = scmp.ne.s32.totalorder %s250_s20, %s333_s21  ;;  %p339_p4 = scmp.lt.s32.totalorder %s333_s21, %s333_s21 }
  0x2c   :  { %p340_p5 = por %p339_p4, %p338_p3 }
  0x2e   :  { %p341_p6 = pnand %p340_p5, %p334_p2 }
  0xfc   :  { %v128_v5 = vpop.f32.mrb[0].mxu0  ;;  %v209_v6 = vpop.f32.mrb[0].mxu1 }
  0xfd   :  { %v129_v7 = vadd.f32 %v259_v4, %v128_v5  ;;  %v273_v8 = vpop.f32.mrb[1].mxu0  ;;  %v278_v9 = vpop.f32.mrb[1].mxu1  ;;  %v210_v35 = vadd.f32 %v262_v32, %v209_v6 }
  0xff   :  { %v214_v10 = vmul.f32 0.70710677, %v129_v7  ;;  %v213_v34 = vmul.f32 0.5, %v129_v7 }
 0x101   :  { %v217_v11 = vand.u32 2147483647, %v214_v10  ;;  %vm215_vm3 = vcmp.ge.f32.partialorder %v214_v10, 0.0 }
 0x102   :  { %v216_v31 = vsel %vm215_vm3, 1.0, %v365_v30 }
 0x103   :  { %v218_v12 = vmul.f32 0.3275911, %v217_v11  ;;  %v231_v14 = vsub.f32 0.0, %v217_v11 }
 0x105   :  { %v219_v13 = vadd.f32 1.0, %v218_v12  ;;  %v232_v16 = vmul.f32 %v231_v14, %v217_v11 }
 0x107   :  { %285 = vrcp.f32 %v219_v13  ;;  %v233_v19 = vmul.f32 1.442695, %v232_v16 }
 0x109   :  { %287 = vpow2.f32 %v233_v19 }
 0x111   :  { %v286_v15 = vpop.eup %285 }
 0x112   :  { %v222_v17 = vmul.f32 1.0614054, %v286_v15 }
 0x113   :  { %v288_v27 = vpop.eup %287 }
 0x114   :  { %v223_v18 = vadd.f32 -1.4531521, %v222_v17 }
 0x116   :  { %v224_v20 = vmul.f32 %v286_v15, %v223_v18 }
 0x118   :  { %v225_v21 = vadd.f32 1.4214138, %v224_v20 }
 0x11a   :  { %v226_v22 = vmul.f32 %v286_v15, %v225_v21 }
 0x11c   :  { %v227_v23 = vadd.f32 -0.28449672, %v226_v22 }
 0x11e   :  { %v228_v24 = vmul.f32 %v286_v15, %v227_v23 }
 0x120   :  { %v229_v25 = vadd.f32 0.2548296, %v228_v24 }
 0x122   :  { %v230_v26 = vmul.f32 %v286_v15, %v229_v25 }
 0x124   :  { %v235_v28 = vmul.f32 %v288_v27, %v230_v26 }
 0x126   :  { %v236_v29 = vsub.f32 1.0, %v235_v28 }
 0x128   :  { %v237_v33 = vmul.f32 %v236_v29, %v216_v31 }
 0x12a   :  { %v238_v36 = vadd.f32 1.0, %v237_v33 }
 0x12c   :  { %v239_v37 = vmul.f32 %v238_v36, %v213_v34 }
 0x12e   :  { %v240_v38 = vadd.f32 %v239_v37, %v210_v35 }
 0x130   :  { %242 = vst.msk [vmem:[#allocation7] sm:$0x3] %vm241_vm4, %v240_v38 }
 0x131   :  { %344 = shalt.err (!%p341_p6)
}
 0x132   :  { %s345_s23 = scalar_lea.hbm %s447_s5, 32 }
 0x133   :  { %p346_p7 = scmp.ne.s32.totalorder %s447_s5, %s345_s23  ;;  %p349_p8 = scmp.lt.u32.totalorder %s345_s23, %s447_s5 }
 0x135   :  { %p351_p9 = pnand %p349_p8, %p346_p7 }
 0x137   :  { %354 = shalt.err (!%p351_p9)
}
 0x138   :  { %252 = dma.vmem_to_hbm [thread:$0]  %s250_s20, 32, %s447_s5, [#allocation4]  }
 0x139   :  { %359 = dma.done.wait [#allocation4], 32  }
 0x13a   :  { %360 = vsyncadd [#allocation4], 4294967264 }
 0x13b   :  { %256 = vsyncpa [#allocation3], 1 }
 0x13c   :  { %257 = vsyncpa [#allocation6], 1 }
 0x13d   :  { %258 = vsyncpa [#allocation4], 1 }

</bundles_post_ra>
